<compile_context>
chip_gen: v6e
topology: v6e:2x2x1
jax: 0.10.0
libtpu: 0.0.40
codegen_flags: <defaults>
</compile_context>

<pallas_src>
import math
import functools

import jax
import jax.numpy as jnp
from jax import lax
from jax.experimental import pallas as pl
from jax.experimental.pallas import tpu as pltpu


# ---------------------------------------------------------------------------
# helpers
# ---------------------------------------------------------------------------
def _pick_tile(dim, target, multiple):
    """Largest multiple of `multiple` <= target that divides `dim` exactly.

    Falls back to the full dim (a block equal to the array dim is always a
    legal BlockSpec, regardless of (8,128) alignment)."""
    if dim <= target:
        return dim
    t = (target // multiple) * multiple
    while t >= multiple:
        if dim % t == 0:
            return t
        t -= multiple
    return dim


def _vmem_limit_bytes(estimate):
    # Leave headroom above the per-step working set. Cap at 3/4 of the
    # physical per-core VMEM (v7x: 48 of 64 MiB; v5e/v6e: 96 of 128 MiB) so
    # compiler-internal scratch and adjacent allocations always fit.
    cap = 48 * 1024 * 1024
    try:
        cap = int(pltpu.get_tpu_info().vmem_capacity_bytes * 3 // 4)
    except Exception:
        pass
    return int(min(max(2 * estimate, 32 * 1024 * 1024), cap))


# ---------------------------------------------------------------------------
# Kernel 1: tiled dense / linear layer   out = x @ W + b
# ---------------------------------------------------------------------------
def _linear_kernel(x_ref, w_ref, b_ref, o_ref, acc_ref):
    @pl.when(pl.program_id(2) == 0)
    def _init():
        acc_ref[...] = jnp.zeros(acc_ref.shape, acc_ref.dtype)

    # bf16 MXU inputs (inputs are already bf16 -> astype is a no-op), f32 acc.
    acc_ref[...] += jnp.dot(
        x_ref[...].astype(jnp.bfloat16),
        w_ref[...].astype(jnp.bfloat16),
        preferred_element_type=jnp.float32,
    )

    @pl.when(pl.program_id(2) == pl.num_programs(2) - 1)
    def _finalize():
        # Bias added once, in f32, at the end of the K reduction.
        o_ref[...] = (acc_ref[...] + b_ref[...].astype(jnp.float32)).astype(o_ref.dtype)


def linear(x2d, w, b, *, out_dtype=None, tm=512, tn=256, tk=512):
    """x2d: (N, din), w: (din, dout), b: (dout,) -> (N, dout)."""
    n, din = x2d.shape
    dout = w.shape[1]
    out_dtype = jnp.dtype(out_dtype if out_dtype is not None else x2d.dtype)

    tm = _pick_tile(n, tm, 8)        # sublane dim of x tile / output tile
    tn = _pick_tile(dout, tn, 128)   # lane dim of w tile / output tile
    tk = _pick_tile(din, tk, 128)    # lane dim of x tile, sublane dim of w
    b2d = b.reshape(1, dout).astype(jnp.float32)

    xb, wb, ob = x2d.dtype.itemsize, w.dtype.itemsize, out_dtype.itemsize
    vmem_est = (2 * (tm * tk * xb + tk * tn * wb + tn * 4)
                + 2 * tm * tn * ob + tm * tn * 4)
    flops = 2 * n * dout * din
    bytes_accessed = n * din * xb + din * dout * wb + n * dout * ob + dout * 4

    return pl.pallas_call(
        _linear_kernel,
        out_shape=jax.ShapeDtypeStruct((n, dout), out_dtype),
        grid_spec=pltpu.PrefetchScalarGridSpec(
            num_scalar_prefetch=0,
            grid=(n // tm, dout // tn, din // tk),
            in_specs=[
                pl.BlockSpec((tm, tk), lambda i, j, k: (i, k)),
                pl.BlockSpec((tk, tn), lambda i, j, k: (k, j)),
                pl.BlockSpec((1, tn), lambda i, j, k: (0, j)),
            ],
            out_specs=pl.BlockSpec((tm, tn), lambda i, j, k: (i, j)),
            scratch_shapes=[pltpu.VMEM((tm, tn), jnp.float32)],
        ),
        compiler_params=pltpu.CompilerParams(
            dimension_semantics=("parallel", "parallel", "arbitrary"),
            vmem_limit_bytes=_vmem_limit_bytes(vmem_est),
        ),
        cost_estimate=pl.CostEstimate(
            flops=flops, transcendentals=0, bytes_accessed=bytes_accessed),
    )(x2d, w, b2d)


# ---------------------------------------------------------------------------
# Kernel 2: flash-style scaled dot-product attention with online softmax.
#           Additive -1e6 causal mask (matching the PyTorch math path), applied
#           only on diagonal-straddling blocks; fully-masked kv blocks skip
#           both compute (pl.when) and DMA (clamped kv index_map).
# ---------------------------------------------------------------------------
def _flash_attn_kernel(q_ref, k_ref, v_ref, o_ref, m_sc, l_sc, acc_sc,
                       *, scale, causal, tq, tk):
    qi = pl.program_id(1)
    ki = pl.program_id(2)

    @pl.when(ki == 0)
    def _init():
        m_sc[...] = jnp.full(m_sc.shape, -jnp.inf, m_sc.dtype)
        l_sc[...] = jnp.zeros(l_sc.shape, l_sc.dtype)
        acc_sc[...] = jnp.zeros(acc_sc.shape, acc_sc.dtype)

    def _block():
        q = q_ref[0]
        if scale != 1.0:          # scale is normally pre-folded into w_qkv
            q = q * scale
        k = k_ref[0]
        v = v_ref[0]

        # Contract the last dims directly -- no materialized k.T.
        s = lax.dot_general(
            q, k, (((1,), (1,)), ((), ())),
            preferred_element_type=jnp.float32)          # (tq, tk) f32

        if causal:
            def _mask(s):
                row = qi * tq + lax.broadcasted_iota(jnp.int32, (tq, tk), 0)
                col = ki * tk + lax.broadcasted_iota(jnp.int32, (tq, tk), 1)
                return s + jnp.where(col > row,
                                     jnp.float32(-1000000.0), jnp.float32(0.0))
            # Mask only blocks that straddle the diagonal; blocks fully below
            # it skip the iota/compare/select/add (pure VALU work) entirely.
            needs_mask = ki * tk + (tk - 1) > qi * tq
            s = lax.cond(needs_mask, _mask, lambda s: s, s)

        # Online softmax update (all f32).
        m_prev = m_sc[...]
        m_new = jnp.maximum(m_prev, s.max(axis=-1, keepdims=True))
        alpha = jnp.exp(m_prev - m_new)
        p = jnp.exp(s - m_new)
        l_sc[...] = alpha * l_sc[...] + p.sum(axis=-1, keepdims=True)
        acc_sc[...] = alpha * acc_sc[...] + jnp.dot(
            p.astype(v.dtype), v, preferred_element_type=jnp.float32)
        m_sc[...] = m_new

    if causal:
        # Skip kv blocks that lie entirely above the diagonal (~2x less work).
        @pl.when(ki * tk <= qi * tq + (tq - 1))
        def _():
            _block()
    else:
        _block()

    @pl.when(ki == pl.num_programs(2) - 1)
    def _finalize():
        inv_l = pl.reciprocal(l_sc[...], approx=True)
        o_ref[0] = (acc_sc[...] * inv_l).astype(o_ref.dtype)


def flash_attention(q, k, v, *, causal, scale=1.0, tq=256, tk=512):
    """q, k, v: (BH, T, D) -> (BH, T, D)."""
    bh, t, dh = q.shape
    tq = _pick_tile(t, tq, 16)    # sublane dim of bf16 q / output tiles
    tk = _pick_tile(t, tk, 128)   # kv rows = lane (N) dim of the score matmul
    nq, nkv = t // tq, t // tk

    kern = functools.partial(_flash_attn_kernel, scale=scale, causal=causal,
                             tq=tq, tk=tk)
    q_spec = pl.BlockSpec((1, tq, dh), lambda b, i, j: (b, i, 0))
    if causal:
        # Clamp the kv block index to the last diagonal-intersecting block:
        # skipped steps re-reference the already-resident block, so Pallas
        # does not issue K/V DMA for fully-masked grid steps.
        def kv_index_map(b, i, j):
            return (b, jnp.minimum(j, (i * tq + tq - 1) // tk), 0)
    else:
        def kv_index_map(b, i, j):
            return (b, j, 0)
    kv_spec = pl.BlockSpec((1, tk, dh), kv_index_map)
    o_spec = pl.BlockSpec((1, tq, dh), lambda b, i, j: (b, i, 0))
    # TODO(synk): sweep (tq, tk) and pipeline_mode=pl.Buffered(3) on kv_spec
    # per generation once real shapes are known.

    eb = q.dtype.itemsize
    vmem_est = (2 * tq * dh * eb             # q, double-buffered
                + 2 * 2 * tk * dh * eb       # k, v double-buffered
                + 2 * tq * dh * eb           # out double-buffered
                + tq * dh * 4 + 2 * tq * 4   # acc / m / l scratch
                + 2 * tq * tk * 4)           # s / p spill slack
    flops = 4 * bh * t * t * dh
    transcendentals = bh * t * t
    if causal:
        flops //= 2
        transcendentals //= 2
    bytes_accessed = 4 * bh * t * dh * eb

    return pl.pallas_call(
        kern,
        out_shape=jax.ShapeDtypeStruct((bh, t, dh), q.dtype),
        grid_spec=pltpu.PrefetchScalarGridSpec(
            num_scalar_prefetch=0,
            grid=(bh, nq, nkv),
            in_specs=[q_spec, kv_spec, kv_spec],
            out_specs=o_spec,
            scratch_shapes=[
                pltpu.VMEM((tq, 1), jnp.float32),   # m (running max)
                pltpu.VMEM((tq, 1), jnp.float32),   # l (running denom)
                pltpu.VMEM((tq, dh), jnp.float32),  # acc
            ],
        ),
        compiler_params=pltpu.CompilerParams(
            dimension_semantics=("parallel", "parallel", "arbitrary"),
            vmem_limit_bytes=_vmem_limit_bytes(vmem_est),
        ),
        cost_estimate=pl.CostEstimate(
            flops=flops, transcendentals=transcendentals,
            bytes_accessed=bytes_accessed),
    )(q, k, v)


# ---------------------------------------------------------------------------
# Module wrapper
# ---------------------------------------------------------------------------
class MultiHeadAttentionPallas:
    def __init__(self, d_model, num_head, causal, flash, key):
        assert d_model % num_head == 0
        self.d_model = d_model
        self.num_head = num_head
        self.d_head = d_model // num_head
        self.causal = causal
        self.flash = flash

        k1, k2, k3, k4 = jax.random.split(key, 4)
        init = lambda k, shape: (jax.random.normal(k, shape, jnp.float32) * 0.02)
        # Logical weights (match the PyTorch module's parameterization).
        # Weights stored bf16 (fast MXU path on all gens); biases stay f32 and
        # are added in f32 at the end of the K reduction.
        self.w_qkv = init(k1, (d_model, 3 * d_model)).astype(jnp.bfloat16)
        self.b_qkv = init(k2, (3 * d_model,))
        self.w_out = init(k3, (d_model, d_model)).astype(jnp.bfloat16)
        self.b_out = init(k4, (d_model,))

        # Fold the 1/sqrt(d_head) softmax scale into the Q columns (layout is
        # '(k h d)', so Q occupies columns [0, d_model)). One-time host-side
        # scaling; the attention kernel then needs no per-block q multiply.
        scale = 1.0 / math.sqrt(self.d_head)
        col_scale = jnp.concatenate([
            jnp.full((d_model,), scale, jnp.float32),
            jnp.ones((2 * d_model,), jnp.float32)])
        self._w_qkv_scaled = (self.w_qkv.astype(jnp.float32)
                              * col_scale[None, :]).astype(jnp.bfloat16)
        self._b_qkv_scaled = self.b_qkv * col_scale

    def __call__(self, x):
        """x: [seq_len, batch, d_model] -> [seq_len, batch, d_model]."""
        t, b, dm = x.shape
        h, dh = self.num_head, self.d_head

        # bf16 activations end-to-end: halves x HBM->VMEM traffic and removes
        # the per-K-step f32->bf16 cast inside the matmul kernel.
        x_bf16 = x.astype(jnp.bfloat16).reshape(t * b, dm)

        # --- qkv projection (tiled Pallas matmul, scale pre-folded into Q) ---
        qkv = linear(x_bf16, self._w_qkv_scaled, self._b_qkv_scaled,
                     out_dtype=jnp.bfloat16)                       # (T*B, 3*dm)

        # rearrange 't b (k h d) -> (b h) t d'
        # TODO(synk): fold these t<->b rearranges into the attention BlockSpec
        # index_maps over a (t, b, 3*d_model) layout (d_head-wide column
        # blocks); needs lane-dense d_head (>=128) to avoid partial-store
        # penalties, so the XLA transposes are kept for now.
        qkv = qkv.reshape(t, b, 3, h, dh).transpose(1, 2, 3, 0, 4)  # (B,3,H,T,D)
        q = qkv[:, 0].reshape(b * h, t, dh)
        k = qkv[:, 1].reshape(b * h, t, dh)
        v = qkv[:, 2].reshape(b * h, t, dh)

        # Reference semantics: PyTorch flash path always runs is_causal=True;
        # the math path masks only when self.causal. (Documented divergence if
        # a non-causal flash config is ever exercised.)
        causal_eff = True if self.flash else self.causal

        attn_v = flash_attention(q, k, v, causal=causal_eff)   # (B*H,T,D) bf16

        # rearrange '(b h) t d -> t b (h d)'
        attn_v = attn_v.reshape(b, h, t, dh).transpose(2, 0, 1, 3).reshape(t * b, dm)

        # --- output projection (tiled Pallas matmul, f32 out) ---
        out = linear(attn_v, self.w_out, self.b_out, out_dtype=x.dtype)
        return out.reshape(t, b, dm)


# ---------------------------------------------------------------------------
# Pure-JAX f32 reference for sanity checking (uses the unscaled weights and an
# explicit softmax scale, mirroring the PyTorch module).
# ---------------------------------------------------------------------------
def reference_forward(mod, x):
    t, b, dm = x.shape
    h, dh = mod.num_head, mod.d_head
    w_qkv = mod.w_qkv.astype(jnp.float32)
    w_out = mod.w_out.astype(jnp.float32)
    qkv = x.reshape(t * b, dm) @ w_qkv + mod.b_qkv
    qkv = qkv.reshape(t, b, 3, h, dh).transpose(1, 2, 3, 0, 4)
    q, k, v = qkv[:, 0], qkv[:, 1], qkv[:, 2]
    scale = 1.0 / math.sqrt(dh)
    s = jnp.einsum("bhtd,bhsd->bhts", q, k) * scale
    causal_eff = True if mod.flash else mod.causal
    if causal_eff:
        mask = jnp.triu(jnp.full((t, t), -1000000.0, jnp.float32), k=1)
        s = s + mask
    p = jax.nn.softmax(s, axis=-1)
    av = jnp.einsum("bhts,bhsd->bhtd", p, v)
    av = av.transpose(2, 0, 1, 3).reshape(t, b, dm)
    out = av.reshape(t * b, dm) @ w_out + mod.b_out
    return out.reshape(t, b, dm)


if __name__ == "__main__":
    key = jax.random.PRNGKey(0)
    kx, kp = jax.random.split(key)

    seq_len, batch, d_model, num_head = 8, 2, 32, 4
    x = jax.random.normal(kx, (seq_len, batch, d_model), jnp.float32)

    mod = MultiHeadAttentionPallas(d_model, num_head, causal=True, flash=False, key=kp)

    out = mod(x)
    out = jax.block_until_ready(out)

    ref = reference_forward(mod, x)
    assert out.shape == (seq_len, batch, d_model)
    # Tolerance accounts for the bf16 MXU path (weights/activations bf16,
    # accumulation and softmax math in f32, approx reciprocal at finalize)
    # vs. the all-f32 reference.
    assert jnp.allclose(out, ref, atol=5e-3, rtol=5e-2), "mismatch vs reference"

    print("KERNEL_OK")
</pallas_src>

<mosaic_0001>
module attributes {stable_mosaic.version = 11 : i64} {
  func.func @_linear_kernel(%arg0: i32, %arg1: i32, %arg2: i32, %arg3: memref<16x32xbf16, #tpu.memory_space<vmem>>, %arg4: memref<32x96xbf16, #tpu.memory_space<vmem>>, %arg5: memref<1x96xf32, #tpu.memory_space<vmem>>, %arg6: memref<16x96xbf16, #tpu.memory_space<vmem>>, %arg7: memref<16x96xf32, #tpu.memory_space<vmem>>) attributes {dimension_semantics = [#tpu.dimension_semantics<parallel>, #tpu.dimension_semantics<parallel>, #tpu.dimension_semantics<arbitrary>], iteration_bounds = array<i64: 1, 1, 1>, scalar_prefetch = 0 : i64, scratch_operands = 1 : i64, tpu.core_type = #tpu.core_type<tc>, window_params = [{transform_indices = @transform_0, window_bounds = array<i64: 16, 32>}, {transform_indices = @transform_1, window_bounds = array<i64: 32, 96>}, {transform_indices = @transform_2, window_bounds = array<i64: 1, 96>}, {transform_indices = @transform_3, window_bounds = array<i64: 16, 96>}]} {
    %c0_i32 = arith.constant 0 : i32
    %0 = arith.cmpi eq, %arg2, %c0_i32 : i32
    %1 = arith.extui %0 : i1 to i32
    %c0_i32_0 = arith.constant 0 : i32
    %2 = arith.cmpi ne, %1, %c0_i32_0 : i32
    scf.if %2 {
      %cst_10 = arith.constant 0.000000e+00 : f32
      %12 = vector.broadcast %cst_10 : f32 to vector<16x96xf32>
      %c0_11 = arith.constant 0 : index
      %c0_12 = arith.constant 0 : index
      %13 = vector.load %arg7[%c0_11, %c0_12] : memref<16x96xf32, #tpu.memory_space<vmem>>, vector<16x96xf32>
      tpu.vector_store %arg7[%c0_11, %c0_12], %12 {strides = array<i32>} : memref<16x96xf32, #tpu.memory_space<vmem>>, vector<16x96xf32>,
    } else {
    }
    %c0 = arith.constant 0 : index
    %c0_1 = arith.constant 0 : index
    %3 = vector.load %arg7[%c0, %c0_1] : memref<16x96xf32, #tpu.memory_space<vmem>>, vector<16x96xf32>
    %c0_2 = arith.constant 0 : index
    %c0_3 = arith.constant 0 : index
    %4 = vector.load %arg3[%c0_2, %c0_3] : memref<16x32xbf16, #tpu.memory_space<vmem>>, vector<16x32xbf16>
    %c0_4 = arith.constant 0 : index
    %c0_5 = arith.constant 0 : index
    %5 = vector.load %arg4[%c0_4, %c0_5] : memref<32x96xbf16, #tpu.memory_space<vmem>>, vector<32x96xbf16>
    %cst = arith.constant dense<0.000000e+00> : vector<16x96xf32>
    %6 = tpu.matmul %4, %5, %cst {dimension_numbers = #tpu.dot_dimension_numbers<[1], [0], [0], [1], [0, 0, 1, 1], [], []>} : vector<16x32xbf16>, vector<32x96xbf16>, vector<16x96xf32> -> vector<16x96xf32>
    %7 = arith.addf %3, %6 : vector<16x96xf32>
    %c0_6 = arith.constant 0 : index
    %c0_7 = arith.constant 0 : index
    %8 = vector.load %arg7[%c0_6, %c0_7] : memref<16x96xf32, #tpu.memory_space<vmem>>, vector<16x96xf32>
    tpu.vector_store %arg7[%c0_6, %c0_7], %7 {strides = array<i32>} : memref<16x96xf32, #tpu.memory_space<vmem>>, vector<16x96xf32>,
    %c0_i32_8 = arith.constant 0 : i32
    %9 = arith.cmpi eq, %arg2, %c0_i32_8 : i32
    %10 = arith.extui %9 : i1 to i32
    %c0_i32_9 = arith.constant 0 : i32
    %11 = arith.cmpi ne, %10, %c0_i32_9 : i32
    scf.if %11 {
      %c0_10 = arith.constant 0 : index
      %c0_11 = arith.constant 0 : index
      %12 = vector.load %arg7[%c0_10, %c0_11] : memref<16x96xf32, #tpu.memory_space<vmem>>, vector<16x96xf32>
      %c0_12 = arith.constant 0 : index
      %c0_13 = arith.constant 0 : index
      %13 = vector.load %arg5[%c0_12, %c0_13] : memref<1x96xf32, #tpu.memory_space<vmem>>, vector<1x96xf32>
      %14 = vector.broadcast %13 : vector<1x96xf32> to vector<16x96xf32>
      %15 = arith.addf %12, %14 : vector<16x96xf32>
      %16 = arith.truncf %15 : vector<16x96xf32> to vector<16x96xbf16>
      %c0_14 = arith.constant 0 : index
      %c0_15 = arith.constant 0 : index
      %17 = vector.load %arg6[%c0_14, %c0_15] : memref<16x96xbf16, #tpu.memory_space<vmem>>, vector<16x96xbf16>
      tpu.vector_store %arg6[%c0_14, %c0_15], %16 {strides = array<i32>} : memref<16x96xbf16, #tpu.memory_space<vmem>>, vector<16x96xbf16>,
    } else {
    }
    return
  }
  func.func @transform_0(%arg0: i32, %arg1: i32, %arg2: i32) -> (i32, i32) {
    %c0_i32 = arith.constant 0 : i32
    return %arg0, %arg2 : i32, i32
  }
  func.func @transform_1(%arg0: i32, %arg1: i32, %arg2: i32) -> (i32, i32) {
    %c0_i32 = arith.constant 0 : i32
    return %arg2, %arg1 : i32, i32
  }
  func.func @transform_2(%arg0: i32, %arg1: i32, %arg2: i32) -> (i32, i32) {
    %c0_i32 = arith.constant 0 : i32
    %c0_i32_0 = arith.constant 0 : i32
    return %c0_i32, %arg1 : i32, i32
  }
  func.func @transform_3(%arg0: i32, %arg1: i32, %arg2: i32) -> (i32, i32) {
    %c0_i32 = arith.constant 0 : i32
    return %arg0, %arg1 : i32, i32
  }
}

</mosaic_0001>

<bundles_post_ra>
// kernel: tpu_custom_call.1
= control target key start
LH: loop header
LB: loop body
LE: loop exit
PB: predicated region body
PF: predicated region fallthrough
CT: control target
= control target key end

     0   :  { %8 = vsyncpa [#allocation4], 0  ;;  %s317_s0 = inlined_call_operand.hbm [shape: bf16[16,32], index: 0, kind: input, shape index: {}]   ;;  %s318_s1 = inlined_call_operand.hbm [shape: bf16[32,96], index: 1, kind: input, shape index: {}]   ;;  %s319_s2 = inlined_call_operand.vmem [shape: f32[1,96], index: 2, kind: input, shape index: {}]   ;;  %s320_s3 = inlined_call_operand.hbm [shape: bf16[16,96], index: 3, kind: output, shape index: {}]  }
   0x1   :  { %9 = vsyncpa [#allocation7], 0 }
   0x2   :  { %10 = vsyncpa [#allocation5], 0  ;;  %s265_s12 = smov [#allocation3]  }
   0x3   :  { %s16_s13 = sshll.u32 %s265_s12, 4  ;;  %s17_s13 = int_to_ptr.vmem [resolvable:$true] %s16_s13 }
   0x4   :  { %s207_s14 = scalar_lea.vmem %s17_s13, 128  ;;  %p212_p1 = scmp.lt.s32.totalorder %s17_s13, %s17_s13 }
   0x5   :  { %p208_p0 = scmp.ne.s32.totalorder %s17_s13, %s207_s14  ;;  %p213_p2 = scmp.lt.s32.totalorder %s207_s14, %s207_s14 }
   0x7   :  { %p214_p3 = por %p213_p2, %p212_p1 }
   0x9   :  { %p215_p4 = pnand %p214_p3, %p208_p0 }
   0xb   :  { %218 = shalt.err (!%p215_p4)
}
   0xc   :  { %s266_s15 = smov 64   ;;  %s267_s16 = smov 4  }
   0xd   :  { %22 = dma.hbm_to_vmem [thread:$0]  %s317_s0, 128, %s17_s13, [#allocation4], %s266_s15, %s266_s15, %s267_s16  }
   0xe   :  { %s268_s19 = smov [#allocation6]  }
   0xf   :  { %s28_s20 = sshll.u32 %s268_s19, 4  ;;  %s29_s20 = int_to_ptr.vmem [resolvable:$true] %s28_s20 }
  0x10   :  { %s227_s21 = scalar_lea.vmem %s29_s20, 256  ;;  %p232_p6 = scmp.lt.s32.totalorder %s29_s20, %s29_s20 }
  0x11   :  { %p228_p5 = scmp.ne.s32.totalorder %s29_s20, %s227_s21  ;;  %p233_p7 = scmp.lt.s32.totalorder %s227_s21, %s227_s21 }
  0x13   :  { %p234_p8 = por %p233_p7, %p232_p6 }
  0x15   :  { %p235_p9 = pnand %p234_p8, %p228_p5 }
  0x17   :  { %238 = shalt.err (!%p235_p9)
}
  0x18   :  { %34 = dma.hbm_to_vmem [thread:$0]  %s318_s1, 256, %s29_s20, [#allocation7], %s266_s15, %s266_s15, %s267_s16  }
  0x19   :  { %259 = dma.done.wait [#allocation4], 128  }
  0x1a   :  { %260 = vsyncadd [#allocation4], 4294967168 }
  0x1b   :  { %261 = dma.done.wait [#allocation7], 256  }
  0x1c   :  { %262 = vsyncadd [#allocation7], 4294967040  ;;  %vm48_vm0 = vcmask 785408   ;;  %v269_v0 = vmov 0.0   ;;  %vm270_vm1 = vmmov 0   ;;  %v196_v1 = vld [vmem:[#allocation6 + $0x8] sm:$0xff]  }
  0x1d   :  { %49 = vst.msk [vmem:[#allocation2] sm:$0xff] %vm48_vm0, %v269_v0  ;;  %50 = vst.msk [vmem:[#allocation2 + $0x8] sm:$0xff] %vm48_vm0, %v269_v0  ;;  %181 = vmatprep.subr.bf16.mxu0 %v269_v0  ;;  %185 = vmatprep.mubr.msk.bf16.mxu0 %vm270_vm1, %v269_v0  ;;  %v197_v2 = vld [vmem:[#allocation6] sm:$0xff]   ;;  %v198_v3 = vld [vmem:[#allocation3] sm:$0xff]   ;;  %vm76_vm2 = vcmask 261120   ;;  %vm148_vm3 = vcmask 781312  }
  0x1e   :  { %182 = vmatpush3.bf16.msra.mxu0 %v196_v1  ;;  %v173_v12 = vld [vmem:[%s319_s2] ss:$0 sm:$0xff]  ;;  %s271_s24 = smov [#allocation8]  }
  0x1f   :  { %183 = vmatprep.subr.bf16.mxu0 %v269_v0  ;;  %s156_s25 = sshll.u32 %s271_s24, 4  ;;  %s157_s25 = int_to_ptr.vmem [resolvable:$true] %s156_s25 }
  0x20   :  { %s239_s26 = scalar_lea.vmem %s157_s25, 128  ;;  %p244_p11 = scmp.lt.s32.totalorder %s157_s25, %s157_s25 }
  0x21   :  { %p240_p10 = scmp.ne.s32.totalorder %s157_s25, %s239_s26  ;;  %p245_p12 = scmp.lt.s32.totalorder %s239_s26, %s239_s26 }
  0x22   :  { %184 = vmatpush3.bf16.msra.mxu0 %v197_v2 }
  0x23   :  { %p246_p13 = por %p245_p12, %p244_p11 }
  0x24   :  { %v51_v4 = vld [vmem:[#allocation2] sm:$0xff]  ;;  %v52_v8 = vld [vmem:[#allocation2 + $0x8] sm:$0xff] }
  0x25   :  { %186 = vmatmul.mubr.msk.bf16.vlgmr.msra.gmra.mxu0 %vm76_vm2, %v198_v3  ;;  %p247_p0 = pnand %p246_p13, %p240_p10 }
  0xe5   :  { %v114_v5 = vpop.f32.mrf.mxu0 }
  0xe6   :  { %v121_v6 = vadd.f32 %v114_v5, %v51_v4 }
  0xe7   :  { %v187_v7 = vpop.f32.mrf.mxu0 }
  0xe8   :  { %124 = vst.msk [vmem:[#allocation2] sm:$0xff] %vm48_vm0, %v121_v6 }
  0xe9   :  { %v117_v9 = vpop.f32.mrf.mxu0 }
  0xea   :  { %v122_v10 = vadd.f32 %v117_v9, %v52_v8 }
  0xeb   :  { %v188_v11 = vpop.f32.mrf.mxu0 }
  0xec   :  { %125 = vst.msk [vmem:[#allocation2 + $0x8] sm:$0xff] %vm48_vm0, %v122_v10 }
  0xef   :  { %v129_v13 = vld [vmem:[#allocation2] sm:$0xff] }
  0xf0   :  { %v138_v14 = vadd.f32 %v173_v12, %v129_v13 }
  0xf2   :  { %v176_v15 = vpack.c.bf16 %v138_v14, %v138_v14 }
  0xf3   :  { %v130_v16 = vld [vmem:[#allocation2 + $0x8] sm:$0xff] }
  0xf4   :  { %v139_v17 = vadd.f32 %v173_v12, %v130_v16  ;;  %149 = vst.msk [vmem:[#allocation8] sm:$0xf] %vm148_vm3, %v176_v15 }
  0xf6   :  { %v177_v18 = vpack.c.bf16 %v139_v17, %v139_v17 }
  0xf8   :  { %150 = vst.msk [vmem:[#allocation8 + $0x4] sm:$0xf] %vm148_vm3, %v177_v18 }
  0xf9   :  { %250 = shalt.err (!%p247_p0)
}
  0xfa   :  { %162 = dma.vmem_to_hbm [thread:$0]  %s157_s25, 128, %s320_s3, [#allocation5], %s266_s15, %s266_s15, %s267_s16  }
  0xfb   :  { %263 = dma.done.wait [#allocation5], 128  }
  0xfc   :  { %264 = vsyncadd [#allocation5], 4294967168 }
  0xfd   :  { %166 = vsyncpa [#allocation4], 1 }
  0xfe   :  { %167 = vsyncpa [#allocation7], 1 }
  0xff   :  { %168 = vsyncpa [#allocation5], 1 }

</bundles_post_ra>
